<compile_context>
chip_gen: v7x
topology: tpu7x:2x2x1
jax: 0.10.0
libtpu: 0.0.40
codegen_flags: <defaults>
</compile_context>

<pallas_src>
import functools

import jax
import jax.numpy as jnp
from jax.experimental import pallas as pl
from jax.experimental.pallas import tpu as pltpu


def _bcp_kernel(min_depth, max_depth, hw,
                x_ref, w1_ref, b1_ref, w2_ref, b2_ref, o_ref, acc_ref):
    k = pl.program_id(1)
    hw_tile = x_ref.shape[-1]
    lane = acc_ref.shape[-1]
    n_chunks = hw_tile // lane
    nk = -(-hw // hw_tile)                       # static grid extent on axis 1

    @pl.when(k == 0)
    def _init():
        acc_ref[...] = jnp.zeros_like(acc_ref)

    def chunk(t):
        # Static 128-lane view of the Ref, cast as it is loaded (no f32 copy
        # of the whole tile is ever materialized).
        return x_ref[:, :, t * lane:(t + 1) * lane].astype(jnp.float32)

    def sum_full_chunks():
        # Small tree of independent partial accumulators (ILP for small C).
        n_par = min(4, n_chunks)
        accs = [None] * n_par
        for t in range(n_chunks):
            c = chunk(t)
            a = t % n_par
            accs[a] = c if accs[a] is None else accs[a] + c
        part = accs[0]
        for extra in accs[1:]:
            part = part + extra
        return part

    if hw % hw_tile == 0:
        # Every tile fully valid: plain cast+add hot loop (HBM-bound).
        acc_ref[...] += sum_full_chunks()
    else:
        rem = hw - (nk - 1) * hw_tile            # static valid lanes, last tile

        @pl.when(k < nk - 1)
        def _body():
            acc_ref[...] += sum_full_chunks()

        @pl.when(k == nk - 1)
        def _last():
            # Only the last tile pays any masking; chunk validity is static.
            part = None
            for t in range(n_chunks):
                lo = t * lane
                if lo >= rem:
                    break                        # fully out-of-range: skip
                c = chunk(t)
                if lo + lane > rem:              # the single partial chunk
                    lanes = jax.lax.broadcasted_iota(jnp.int32, (1, 1, lane), 2)
                    c = jnp.where(lanes < (rem - lo), c, 0.0)
                part = c if part is None else part + c
            acc_ref[...] += part

    # ---- finalize: pooled mean -> MLP -> softmax -> bin centers ----
    @pl.when(k == nk - 1)
    def _finalize():
        pooled = jnp.sum(acc_ref[...], axis=-1) * (1.0 / float(hw))    # (1, C)

        h = jnp.dot(pooled, w1_ref[...].astype(jnp.float32),
                    preferred_element_type=jnp.float32)
        h = h + b1_ref[...].astype(jnp.float32)
        h = 0.5 * h * (1.0 + jax.lax.erf(h * 0.7071067811865476))     # exact GELU

        logits = jnp.dot(h, w2_ref[...].astype(jnp.float32),
                         preferred_element_type=jnp.float32)
        logits = logits + b2_ref[...].astype(jnp.float32)

        m = jnp.max(logits, axis=-1, keepdims=True)
        e = jnp.exp(logits - m)
        # NOTE: the reference divides by the softmax sum a second time; that is
        # a mathematical no-op and is deliberately not re-applied here.
        bins = e / jnp.sum(e, axis=-1, keepdims=True)                  # softmax
        widths = (max_depth - min_depth) * bins                        # (1, D)

        # centers_j = min_depth + sum_{k<j} w_k + 0.5*w_j, i.e. the
        # pad(min_depth) -> cumsum -> midpoint pipeline as one MXU matmul with
        # an in-kernel triangular matrix (no extra HBM input).
        d = o_ref.shape[-1]
        kk = jax.lax.broadcasted_iota(jnp.int32, (d, d), 0)
        jj = jax.lax.broadcasted_iota(jnp.int32, (d, d), 1)
        tri = jnp.where(kk < jj, 1.0,
                        jnp.where(kk == jj, 0.5, 0.0)).astype(jnp.float32)
        centers = min_depth + jnp.dot(widths, tri,
                                      preferred_element_type=jnp.float32)
        o_ref[...] = centers[None].astype(o_ref.dtype)                 # (1, 1, D)


def _vmem_budget():
    """(per-buffer target bytes for the x tile, vmem_limit_bytes), by chip."""
    try:
        cap = int(pltpu.get_tpu_info().vmem_capacity_bytes)
    except Exception:
        cap = 64 * 1024 * 1024                   # conservative (v7x-sized)
    if cap >= 100 * 1024 * 1024:                 # v5e / v6e: 128 MiB physical
        return 12 * 1024 * 1024, 64 * 1024 * 1024
    # v7x: 64 MiB physical, 32 MiB scoped default
    return 8 * 1024 * 1024, 40 * 1024 * 1024


def _pick_hw_tile(c, hw, itemsize, target_bytes):
    """Largest lane-dense (multiple-of-128) spatial tile whose double-buffered
    footprint stays within the per-generation budget."""
    max_lanes = max(128, int((target_bytes // max(1, c * itemsize)) // 128) * 128)
    if hw <= max_lanes:
        return int(hw)          # single full-extent block is always legal
    return int(max_lanes)       # multiple of 128; ragged last block is masked


def bcp_forward(x, w1, b1, w2, b2, *, min_depth, max_depth, hw_tile=None):
    """x: (N, C, H, W) NCHW (any float dtype).  w1: (C, hidden), b1: (hidden,),
    w2: (hidden, D), b2: (D,) -- Linear weights pre-transposed to (in, out).
    Returns (N, D, 1, 1) float32 bin centers."""
    n, c, h, w = x.shape
    hw = h * w
    hidden = w1.shape[1]
    dout = w2.shape[1]

    x3 = x.reshape(n, c, hw)          # free reshape, keep input dtype (no astype)
    b1r = b1.reshape(1, hidden)
    b2r = b2.reshape(1, dout)

    target_bytes, vmem_limit = _vmem_budget()
    if hw_tile is None:
        hw_tile = _pick_hw_tile(c, hw, x.dtype.itemsize, target_bytes)
    assert hw_tile == hw or (hw_tile % 128 == 0 and hw_tile <= hw), hw_tile
    lane = 128 if hw_tile % 128 == 0 else hw_tile
    num_k = pl.cdiv(hw, hw_tile)

    # TODO(synk): min/max depth are baked in as Python floats (like the PyTorch
    # module's constructor args); distinct values retrace.
    kernel = functools.partial(_bcp_kernel, float(min_depth), float(max_depth), hw)

    cost = pl.CostEstimate(
        flops=int(n * c * hw
                  + 2 * n * (c * hidden + hidden * dout + dout * dout)),
        transcendentals=int(n * (hidden + dout)),
        bytes_accessed=int(x3.size * x3.dtype.itemsize
                           + w1.size * w1.dtype.itemsize
                           + w2.size * w2.dtype.itemsize
                           + b1.size * b1.dtype.itemsize
                           + b2.size * b2.dtype.itemsize
                           + n * dout * 4),
    )

    centers = pl.pallas_call(
        kernel,
        out_shape=jax.ShapeDtypeStruct((n, 1, dout), jnp.float32),
        grid_spec=pltpu.PrefetchScalarGridSpec(
            num_scalar_prefetch=0,
            grid=(n, num_k),
            in_specs=[
                pl.BlockSpec((1, c, hw_tile), lambda i, k: (i, 0, k)),
                pl.BlockSpec((c, hidden), lambda i, k: (0, 0)),
                pl.BlockSpec((1, hidden), lambda i, k: (0, 0)),
                pl.BlockSpec((hidden, dout), lambda i, k: (0, 0)),
                pl.BlockSpec((1, dout), lambda i, k: (0, 0)),
            ],
            out_specs=pl.BlockSpec((1, 1, dout), lambda i, k: (i, 0, 0)),
            scratch_shapes=[pltpu.VMEM((1, c, lane), jnp.float32)],
        ),
        compiler_params=pltpu.CompilerParams(
            dimension_semantics=("parallel", "arbitrary"),
            vmem_limit_bytes=int(vmem_limit),
        ),
        cost_estimate=cost,
    )(x3, w1, b1r, w2, b2r)

    return centers.reshape(n, dout, 1, 1)


def _reference(x, w1, b1, w2, b2, *, min_depth, max_depth):
    """Pure-JAX reference mirroring the PyTorch forward (dropout p=0 -> identity)."""
    n, c, h, w = x.shape
    p = jnp.mean(x.reshape(n, c, h * w).astype(jnp.float32), axis=2)
    a = p @ w1.astype(jnp.float32) + b1.astype(jnp.float32)
    a = 0.5 * a * (1.0 + jax.lax.erf(a / jnp.sqrt(2.0)))
    o = a @ w2.astype(jnp.float32) + b2.astype(jnp.float32)
    bins = jax.nn.softmax(o, axis=1)
    bins = bins / jnp.sum(bins, axis=1, keepdims=True)
    widths = (max_depth - min_depth) * bins
    widths = jnp.pad(widths, ((0, 0), (1, 0)), constant_values=min_depth)
    edges = jnp.cumsum(widths, axis=1)
    centers = 0.5 * (edges[:, :-1] + edges[:, 1:])
    return centers.reshape(n, -1, 1, 1)


if __name__ == "__main__":
    MIN_DEPTH, MAX_DEPTH = 1e-3, 10.0
    key = jax.random.PRNGKey(0)

    # ---- test 1: f32 input, lane-dense spatial, multi-step gridded pool ----
    N, C, H, W = 2, 128, 16, 16
    HIDDEN, DOUT = 256, 128
    kx, k1, k2, k3, k4, key = jax.random.split(key, 6)
    x = jax.random.normal(kx, (N, C, H, W), dtype=jnp.float32)
    w1 = jax.random.normal(k1, (C, HIDDEN), dtype=jnp.float32) * 0.02
    b1 = jax.random.normal(k2, (HIDDEN,), dtype=jnp.float32) * 0.02
    w2 = jax.random.normal(k3, (HIDDEN, DOUT), dtype=jnp.float32) * 0.02
    b2 = jax.random.normal(k4, (DOUT,), dtype=jnp.float32) * 0.02

    out = bcp_forward(x, w1, b1, w2, b2,
                      min_depth=MIN_DEPTH, max_depth=MAX_DEPTH, hw_tile=128)
    out = jax.block_until_ready(out)
    ref = _reference(x, w1, b1, w2, b2, min_depth=MIN_DEPTH, max_depth=MAX_DEPTH)
    assert out.shape == (N, DOUT, 1, 1)
    assert jnp.allclose(out, ref, atol=1e-4, rtol=1e-4)

    # ---- test 2: bf16 streamed input, ragged spatial (masked last tile only) ----
    N2, C2, H2, W2 = 2, 64, 15, 20            # H*W = 300, not a multiple of 128
    HIDDEN2, DOUT2 = 128, 64
    kx, k1, k2, k3, k4, key = jax.random.split(key, 6)
    x2 = jax.random.normal(kx, (N2, C2, H2, W2), dtype=jnp.float32).astype(jnp.bfloat16)
    w1_2 = jax.random.normal(k1, (C2, HIDDEN2), dtype=jnp.float32) * 0.02
    b1_2 = jax.random.normal(k2, (HIDDEN2,), dtype=jnp.float32) * 0.02
    w2_2 = jax.random.normal(k3, (HIDDEN2, DOUT2), dtype=jnp.float32) * 0.02
    b2_2 = jax.random.normal(k4, (DOUT2,), dtype=jnp.float32) * 0.02

    out2 = bcp_forward(x2, w1_2, b1_2, w2_2, b2_2,
                       min_depth=MIN_DEPTH, max_depth=MAX_DEPTH, hw_tile=128)
    out2 = jax.block_until_ready(out2)
    ref2 = _reference(x2, w1_2, b1_2, w2_2, b2_2,
                      min_depth=MIN_DEPTH, max_depth=MAX_DEPTH)
    assert out2.shape == (N2, DOUT2, 1, 1)
    assert jnp.allclose(out2, ref2, atol=1e-4, rtol=1e-4)

    # ---- test 3: auto (generation-aware) tile pick -> single full-extent block ----
    N3, C3, H3, W3 = 1, 32, 15, 20
    HIDDEN3, DOUT3 = 64, 32
    kx, k1, k2, k3, k4, key = jax.random.split(key, 6)
    x3 = jax.random.normal(kx, (N3, C3, H3, W3), dtype=jnp.float32)
    w1_3 = jax.random.normal(k1, (C3, HIDDEN3), dtype=jnp.float32) * 0.02
    b1_3 = jax.random.normal(k2, (HIDDEN3,), dtype=jnp.float32) * 0.02
    w2_3 = jax.random.normal(k3, (HIDDEN3, DOUT3), dtype=jnp.float32) * 0.02
    b2_3 = jax.random.normal(k4, (DOUT3,), dtype=jnp.float32) * 0.02

    out3 = bcp_forward(x3, w1_3, b1_3, w2_3, b2_3,
                       min_depth=MIN_DEPTH, max_depth=MAX_DEPTH)   # hw_tile=None
    out3 = jax.block_until_ready(out3)
    ref3 = _reference(x3, w1_3, b1_3, w2_3, b2_3,
                      min_depth=MIN_DEPTH, max_depth=MAX_DEPTH)
    assert out3.shape == (N3, DOUT3, 1, 1)
    assert jnp.allclose(out3, ref3, atol=1e-4, rtol=1e-4)

    print("KERNEL_OK")
</pallas_src>

<mosaic_0001>
module attributes {stable_mosaic.version = 11 : i64} {
  func.func @_bcp_kernel(%arg0: i32, %arg1: i32, %arg2: memref<1x128x128xf32, #tpu.memory_space<vmem>>, %arg3: memref<128x256xf32, #tpu.memory_space<vmem>>, %arg4: memref<1x256xf32, #tpu.memory_space<vmem>>, %arg5: memref<256x128xf32, #tpu.memory_space<vmem>>, %arg6: memref<1x128xf32, #tpu.memory_space<vmem>>, %arg7: memref<1x1x128xf32, #tpu.memory_space<vmem>>, %arg8: memref<1x128x128xf32, #tpu.memory_space<vmem>>) attributes {dimension_semantics = [#tpu.dimension_semantics<parallel>, #tpu.dimension_semantics<arbitrary>], iteration_bounds = array<i64: 2, 2>, scalar_prefetch = 0 : i64, scratch_operands = 1 : i64, tpu.core_type = #tpu.core_type<tc>, window_params = [{transform_indices = @transform_0, window_bounds = array<i64: 1, 128, 128>}, {pipeline_mode = #tpu.pipeline_mode<synchronous>, transform_indices = @transform_1, window_bounds = array<i64: 128, 256>}, {pipeline_mode = #tpu.pipeline_mode<synchronous>, transform_indices = @transform_2, window_bounds = array<i64: 1, 256>}, {pipeline_mode = #tpu.pipeline_mode<synchronous>, transform_indices = @transform_3, window_bounds = array<i64: 256, 128>}, {pipeline_mode = #tpu.pipeline_mode<synchronous>, transform_indices = @transform_4, window_bounds = array<i64: 1, 128>}, {transform_indices = @transform_5, window_bounds = array<i64: 1, 1, 128>}]} {
    %c0_i32 = arith.constant 0 : i32
    %0 = arith.cmpi eq, %arg1, %c0_i32 : i32
    %1 = arith.extui %0 : i1 to i32
    %c0_i32_0 = arith.constant 0 : i32
    %2 = arith.cmpi ne, %1, %c0_i32_0 : i32
    scf.if %2 {
      %cst = arith.constant 0.000000e+00 : f32
      %10 = vector.broadcast %cst : f32 to vector<1x128x128xf32>
      %c0_10 = arith.constant 0 : index
      %c0_11 = arith.constant 0 : index
      %c0_12 = arith.constant 0 : index
      %11 = vector.load %arg8[%c0_10, %c0_11, %c0_12] : memref<1x128x128xf32, #tpu.memory_space<vmem>>, vector<1x128x128xf32>
      tpu.vector_store %arg8[%c0_10, %c0_11, %c0_12], %10 {strides = array<i32>} : memref<1x128x128xf32, #tpu.memory_space<vmem>>, vector<1x128x128xf32>,
    } else {
    }
    %c0 = arith.constant 0 : index
    %c0_1 = arith.constant 0 : index
    %c0_2 = arith.constant 0 : index
    %3 = vector.load %arg8[%c0, %c0_1, %c0_2] : memref<1x128x128xf32, #tpu.memory_space<vmem>>, vector<1x128x128xf32>
    %c0_3 = arith.constant 0 : index
    %c0_4 = arith.constant 0 : index
    %c0_5 = arith.constant 0 : index
    %4 = vector.load %arg2[%c0_3, %c0_4, %c0_5] : memref<1x128x128xf32, #tpu.memory_space<vmem>>, vector<1x128x128xf32>
    %5 = arith.addf %3, %4 : vector<1x128x128xf32>
    %c0_6 = arith.constant 0 : index
    %c0_7 = arith.constant 0 : index
    %c0_8 = arith.constant 0 : index
    %6 = vector.load %arg8[%c0_6, %c0_7, %c0_8] : memref<1x128x128xf32, #tpu.memory_space<vmem>>, vector<1x128x128xf32>
    tpu.vector_store %arg8[%c0_6, %c0_7, %c0_8], %5 {strides = array<i32>} : memref<1x128x128xf32, #tpu.memory_space<vmem>>, vector<1x128x128xf32>,
    %c1_i32 = arith.constant 1 : i32
    %7 = arith.cmpi eq, %arg1, %c1_i32 : i32
    %8 = arith.extui %7 : i1 to i32
    %c0_i32_9 = arith.constant 0 : i32
    %9 = arith.cmpi ne, %8, %c0_i32_9 : i32
    scf.if %9 {
      %c0_10 = arith.constant 0 : index
      %c0_11 = arith.constant 0 : index
      %c0_12 = arith.constant 0 : index
      %10 = vector.load %arg8[%c0_10, %c0_11, %c0_12] : memref<1x128x128xf32, #tpu.memory_space<vmem>>, vector<1x128x128xf32>
      %cst = arith.constant dense<0.000000e+00> : vector<1x128xf32>
      %11 = vector.multi_reduction <add>, %10, %cst [2] : vector<1x128x128xf32> to vector<1x128xf32>
      %cst_13 = arith.constant 3.906250e-03 : f32
      %12 = vector.broadcast %cst_13 : f32 to vector<1x128xf32>
      %13 = arith.mulf %11, %12 : vector<1x128xf32>
      %c0_14 = arith.constant 0 : index
      %c0_15 = arith.constant 0 : index
      %14 = vector.load %arg3[%c0_14, %c0_15] : memref<128x256xf32, #tpu.memory_space<vmem>>, vector<128x256xf32>
      %cst_16 = arith.constant dense<0.000000e+00> : vector<1x256xf32>
      %15 = tpu.matmul %13, %14, %cst_16 {dimension_numbers = #tpu.dot_dimension_numbers<[1], [0], [0], [1], [0, 0, 1, 1], [], []>} : vector<1x128xf32>, vector<128x256xf32>, vector<1x256xf32> -> vector<1x256xf32>
      %c0_17 = arith.constant 0 : index
      %c0_18 = arith.constant 0 : index
      %16 = vector.load %arg4[%c0_17, %c0_18] : memref<1x256xf32, #tpu.memory_space<vmem>>, vector<1x256xf32>
      %17 = arith.addf %15, %16 : vector<1x256xf32>
      %cst_19 = arith.constant 5.000000e-01 : f32
      %18 = vector.broadcast %cst_19 : f32 to vector<1x256xf32>
      %19 = arith.mulf %18, %17 : vector<1x256xf32>
      %cst_20 = arith.constant 0.707106769 : f32
      %20 = vector.broadcast %cst_20 : f32 to vector<1x256xf32>
      %21 = arith.mulf %17, %20 : vector<1x256xf32>
      %22 = math.erf %21 : vector<1x256xf32>
      %cst_21 = arith.constant 1.000000e+00 : f32
      %23 = vector.broadcast %cst_21 : f32 to vector<1x256xf32>
      %24 = arith.addf %23, %22 : vector<1x256xf32>
      %25 = arith.mulf %19, %24 : vector<1x256xf32>
      %c0_22 = arith.constant 0 : index
      %c0_23 = arith.constant 0 : index
      %26 = vector.load %arg5[%c0_22, %c0_23] : memref<256x128xf32, #tpu.memory_space<vmem>>, vector<256x128xf32>
      %cst_24 = arith.constant dense<0.000000e+00> : vector<1x128xf32>
      %27 = tpu.matmul %25, %26, %cst_24 {dimension_numbers = #tpu.dot_dimension_numbers<[1], [0], [0], [1], [0, 0, 1, 1], [], []>} : vector<1x256xf32>, vector<256x128xf32>, vector<1x128xf32> -> vector<1x128xf32>
      %c0_25 = arith.constant 0 : index
      %c0_26 = arith.constant 0 : index
      %28 = vector.load %arg6[%c0_25, %c0_26] : memref<1x128xf32, #tpu.memory_space<vmem>>, vector<1x128xf32>
      %29 = arith.addf %27, %28 : vector<1x128xf32>
      %cst_27 = arith.constant dense<0xFF800000> : vector<1xf32>
      %30 = vector.multi_reduction <maximumf>, %29, %cst_27 [1] : vector<1x128xf32> to vector<1xf32>
      %31 = vector.shape_cast %30 : vector<1xf32> to vector<1x1xf32>
      %32 = vector.broadcast %31 : vector<1x1xf32> to vector<1x128xf32>
      %33 = arith.subf %29, %32 : vector<1x128xf32>
      %34 = math.exp %33 : vector<1x128xf32>
      %cst_28 = arith.constant dense<0.000000e+00> : vector<1xf32>
      %35 = vector.multi_reduction <add>, %34, %cst_28 [1] : vector<1x128xf32> to vector<1xf32>
      %36 = vector.shape_cast %35 : vector<1xf32> to vector<1x1xf32>
      %37 = vector.broadcast %36 : vector<1x1xf32> to vector<1x128xf32>
      %38 = arith.divf %34, %37 : vector<1x128xf32>
      %cst_29 = arith.constant 9.99899959 : f32
      %39 = vector.broadcast %cst_29 : f32 to vector<1x128xf32>
      %40 = arith.mulf %39, %38 : vector<1x128xf32>
      %41 = tpu.iota {dimensions = array<i32: 0>} : vector<128x128xi32>
      %42 = tpu.iota {dimensions = array<i32: 1>} : vector<128x128xi32>
      %43 = arith.cmpi slt, %41, %42 : vector<128x128xi32>
      %44 = arith.cmpi eq, %41, %42 : vector<128x128xi32>
      %cst_30 = arith.constant 5.000000e-01 : f32
      %cst_31 = arith.constant 0.000000e+00 : f32
      %45 = vector.broadcast %cst_30 : f32 to vector<128x128xf32>
      %46 = vector.broadcast %cst_31 : f32 to vector<128x128xf32>
      %47 = arith.select %44, %45, %46 : vector<128x128xi1>, vector<128x128xf32>
      %cst_32 = arith.constant 1.000000e+00 : f32
      %48 = vector.broadcast %cst_32 : f32 to vector<128x128xf32>
      %49 = arith.select %43, %48, %47 : vector<128x128xi1>, vector<128x128xf32>
      %cst_33 = arith.constant dense<0.000000e+00> : vector<1x128xf32>
      %50 = tpu.matmul %40, %49, %cst_33 {dimension_numbers = #tpu.dot_dimension_numbers<[1], [0], [0], [1], [0, 0, 1, 1], [], []>} : vector<1x128xf32>, vector<128x128xf32>, vector<1x128xf32> -> vector<1x128xf32>
      %cst_34 = arith.constant 1.000000e-03 : f32
      %51 = vector.broadcast %cst_34 : f32 to vector<1x128xf32>
      %52 = arith.addf %51, %50 : vector<1x128xf32>
      %53 = vector.shape_cast %52 : vector<1x128xf32> to vector<1x1x128xf32>
      %c0_35 = arith.constant 0 : index
      %c0_36 = arith.constant 0 : index
      %c0_37 = arith.constant 0 : index
      %54 = vector.load %arg7[%c0_35, %c0_36, %c0_37] : memref<1x1x128xf32, #tpu.memory_space<vmem>>, vector<1x1x128xf32>
      tpu.vector_store %arg7[%c0_35, %c0_36, %c0_37], %53 {strides = array<i32>} : memref<1x1x128xf32, #tpu.memory_space<vmem>>, vector<1x1x128xf32>,
    } else {
    }
    return
  }
  func.func @transform_0(%arg0: i32, %arg1: i32) -> (i32, i32, i32) {
    %c0_i32 = arith.constant 0 : i32
    %c0_i32_0 = arith.constant 0 : i32
    return %arg0, %c0_i32, %arg1 : i32, i32, i32
  }
  func.func @transform_1(%arg0: i32, %arg1: i32) -> (i32, i32) {
    %c0_i32 = arith.constant 0 : i32
    %c0_i32_0 = arith.constant 0 : i32
    %c0_i32_1 = arith.constant 0 : i32
    return %c0_i32, %c0_i32_0 : i32, i32
  }
  func.func @transform_2(%arg0: i32, %arg1: i32) -> (i32, i32) {
    %c0_i32 = arith.constant 0 : i32
    %c0_i32_0 = arith.constant 0 : i32
    %c0_i32_1 = arith.constant 0 : i32
    return %c0_i32, %c0_i32_0 : i32, i32
  }
  func.func @transform_3(%arg0: i32, %arg1: i32) -> (i32, i32) {
    %c0_i32 = arith.constant 0 : i32
    %c0_i32_0 = arith.constant 0 : i32
    %c0_i32_1 = arith.constant 0 : i32
    return %c0_i32, %c0_i32_0 : i32, i32
  }
  func.func @transform_4(%arg0: i32, %arg1: i32) -> (i32, i32) {
    %c0_i32 = arith.constant 0 : i32
    %c0_i32_0 = arith.constant 0 : i32
    %c0_i32_1 = arith.constant 0 : i32
    return %c0_i32, %c0_i32_0 : i32, i32
  }
  func.func @transform_5(%arg0: i32, %arg1: i32) -> (i32, i32, i32) {
    %c0_i32 = arith.constant 0 : i32
    %c0_i32_0 = arith.constant 0 : i32
    %c0_i32_1 = arith.constant 0 : i32
    return %arg0, %c0_i32, %c0_i32_0 : i32, i32, i32
  }
}

</mosaic_0001>

<bundles_post_ra>
// kernel: tpu_custom_call.1
= control target key start
LH: loop header
LB: loop body
LE: loop exit
PB: predicated region body
PF: predicated region fallthrough
CT: control target
= control target key end

     0   :  { %s2110_s0 = inlined_call_operand.hbm [shape: f32[2,128,256], index: 0, kind: input, shape index: {}]   ;;  %s2111_s1 = inlined_call_operand.hbm [shape: f32[128,256], index: 1, kind: input, shape index: {}]   ;;  %s2112_s2 = inlined_call_operand.vmem [shape: f32[1,256], index: 2, kind: input, shape index: {}]   ;;  %s2113_s3 = inlined_call_operand.hbm [shape: f32[256,128], index: 3, kind: input, shape index: {}]   ;;  %s2114_s4 = inlined_call_operand.vmem [shape: f32[1,128], index: 4, kind: input, shape index: {}]   ;;  %s2115_s5 = inlined_call_operand.hbm [shape: f32[2,1,128], index: 5, kind: output, shape index: {}]  }
   0x1   :  { %2130 = sst [smem:[#allocation17_spill]] %s2111_s1 }
   0x2   :  { %2131 = sst [smem:[#allocation18_spill]] %s2113_s3 }
   0x3   :  { %2132 = sst [smem:[#allocation19_spill]] %s2115_s5 }
   0x4   :  { %10 = vsyncpa [#allocation4], 0 }
   0x5   :  { %12 = vsyncpa [#allocation4 + $0x1], 0 }
   0x6   :  { %13 = vsyncpa [#allocation7], 0 }
   0x7   :  { %14 = vsyncpa [#allocation5], 0 }
   0x8   :  { %16 = vsyncpa [#allocation5 + $0x1], 0  ;;  %s1658_s18 = smov 0   ;;  %s1660_s19 = smov 0  }
   0x9   :  { %s1662_s20 = smov 0   ;;  %s1664_s21 = smov 0  }
   0xa   :  { %s1666_s22 = smov 0   ;;  %s1668_s23 = smov 0  }
   0xb   :  { %s1670_s24 = smov 0   ;;  %s1672_s25 = smov 0  }
   0xc   :  { %s1674_s26 = smov 0   ;;  %s1676_s27 = smov 0  }
   0xd   :  { %s1678_s28 = smov 0  }
   0xe LB: > { %2133 = sst [smem:[#allocation13_spill]] %s1574_s18  ;;  %s1070_s29 = sadd.s32 4294967295, %s1614_s28   ;;  %s1614_s28 = sphi %s1678_s28, %s22_s28   ;;  %s1610_s27 = sphi %s1676_s27, %s2172_s27   ;;  %s1606_s26 = sphi %s1674_s26, %s2171_s26   ;;  %s1602_s25 = sphi %s1672_s25, %s2170_s25   ;;  %s1598_s24 = sphi %s1670_s24, %s2169_s24   ;;  %s1594_s23 = sphi %s1668_s23, %s2168_s23   ;;  %s1590_s22 = sphi %s1666_s22, %s2167_s22   ;;  %s1586_s21 = sphi %s1664_s21, %s2166_s21   ;;  %s1582_s20 = sphi %s1662_s20, %s2165_s20   ;;  %s1578_s19 = sphi %s1660_s19, %s2164_s19   ;;  %s1574_s18 = sphi %s1658_s18, %s2163_s18  }
   0xf   : > { %2134 = sst [smem:[#allocation14_spill]] %s1614_s28  ;;  %s1071_s30 = sadd.s32 4294967294, %s1614_s28  }
  0x10   : > { %p50_p0 = scmp.ne.s32.totalorder %s1594_s23, %s1590_s22  ;;  %p51_p1 = scmp.eq.s32.totalorder %s1614_s28, 0 }
  0x11   : > { %p56_p2 = scmp.ne.s32.totalorder %s1590_s22, %s1586_s21  ;;  %p1718_p3 = scmp.eq.s32.totalorder %s1070_s29, 0 }
  0x12   : > { %p1723_p4 = por %p51_p1, %p50_p0  ;;  %p163_p5 = scmp.ne.s32.totalorder %s1582_s20, %s1578_s19 }
  0x13   : > { %s2135_s7 = scalar_select %p1718_p3, 1, 0 }
  0x14   : > { %p1731_p6 = por %p1718_p3, %p56_p2  ;;  %p164_p7 = scmp.eq.s32.totalorder %s1070_s29, 3 }
  0x15   : > { %p169_p8 = scmp.ne.s32.totalorder %s1578_s19, %s1574_s18  ;;  %p170_p9 = scmp.eq.s32.totalorder %s1071_s30, 3 }
  0x16   : > { %s2137_s10 = scalar_select %p1731_p6, 1, 0 }
  0x17   : > { %p1737_p10 = por %p164_p7, %p163_p5  ;;  %p1072_p11 = scmp.ge.s32.totalorder %s1614_s28, 1 }
  0x18   : > { %p1742_p12 = por %p170_p9, %p169_p8  ;;  %p177_p13 = scmp.lt.s32.totalorder %s1614_s28, 5 }
  0x19   : > { %s2138_s11 = scalar_select %p1737_p10, 1, 0 }
  0x1a   : > { %s2140_s12 = scalar_select %p1742_p12, 1, 0 }
  0x1b   : > { %2139 = sst [smem:[#allocation15_spill]] %s2138_s11  ;;  %p1747_p0 = pnand %p1072_p11, %p177_p13 }
  0x1c   : > { %2141 = sst [smem:[#allocation16_spill]] %s2140_s12  ;;  %s1616_s14 = smov [#allocation6]  }
  0x1d   : > { %s189_s15 = sshll.u32 %s1616_s14, 4  ;;  %p1275_p1 = pneg %p1747_p0  ;;  %s1751_s15 = int_to_ptr.vmem [resolvable:$true] %s189_s15 }
  0x1e   : > { %p1292_p2 = scmp.lt.s32.totalorder %s1614_s28, 4  ;;  %s1617_s21 = smov [#allocation8]  }
  0x1f   : > { %p1758_p5 = pnand %p1275_p1, %p1718_p3  ;;  %s205_s29 = sshll.u32 %s1617_s21, 4  ;;  %s1768_s29 = int_to_ptr.vmem [resolvable:$true] %s205_s29 }
  0x20   : > { %p1764_p7 = pnand %p1292_p2, %p1723_p4  ;;  %s2145_s1 = sld [smem:[#allocation17_spill]] }
  0x21   : > { %p1404_p9 = pneg %p1758_p5 }
  0x26   : > { %s1402_s6 = scalar_lea.hbm %s2145_s1, 4096 }
  0x27   : > { %p1403_p8 = scmp.ne.s32.totalorder %s2145_s1, %s1402_s6  ;;  %p1409_p13 = scmp.lt.u32.totalorder %s1402_s6, %s2145_s1 }
  0x29   : > { %p1405_p4 = pnand %p1404_p9, %p1403_p8 }
  0x2b   : > { %p1406_p11 = pneg %p1405_p4 }
  0x2d   : > { %p1411_p1 = pnand %p1409_p13, %p1406_p11 }
  0x2f   : > { %1414 = shalt.err (!%p1411_p1)
}
  0x30   : > { %s1415_s21 = scalar_lea.vmem %s1751_s15, 4096  ;;  %p1423_p3 = scmp.lt.s32.totalorder %s1751_s15, %s1751_s15 }
  0x31   : > { %p1416_p2 = scmp.ne.s32.totalorder %s1751_s15, %s1415_s21  ;;  %p1424_p8 = scmp.lt.s32.totalorder %s1415_s21, %s1415_s21 }
  0x33   : > { %p1418_p12 = pnand %p1416_p2, %p1404_p9  ;;  %p1425_p4 = por %p1424_p8, %p1423_p3 }
  0x35   : > { %p1419_p10 = pneg %p1418_p12 }
  0x37   : > { %p1426_p6 = pnand %p1425_p4, %p1419_p10 }
  0x39   : > { %1429 = shalt.err (!%p1426_p6)
}
  0x3a   : > { %s2127_s18 = smov 256   ;;  %s1619_s6 = smov 16  }
  0x3b   : > { %1278 = dma.hbm_to_vmem [thread:$0]  (!%p1758_p5), %s2145_s1, 4096, %s1751_s15, [#allocation7], %s2127_s18, %s2127_s18, %s1619_s6  }
  0x3c   : > { %s2146_s3 = sld [smem:[#allocation18_spill]] }
  0x42   : > { %s1430_s9 = scalar_lea.hbm %s2146_s3, 4096 }
  0x43   : > { %p1431_p3 = scmp.ne.s32.totalorder %s2146_s3, %s1430_s9  ;;  %p1437_p12 = scmp.lt.u32.totalorder %s1430_s9, %s2146_s3 }
  0x45   : > { %p1433_p6 = pnand %p1431_p3, %p1404_p9 }
  0x47   : > { %p1434_p10 = pneg %p1433_p6 }
  0x49   : > { %p1439_p11 = pnand %p1437_p12, %p1434_p10 }
  0x4b   : > { %1442 = shalt.err (!%p1439_p11)
}
  0x4c   : > { %s1443_s15 = scalar_lea.vmem %s1768_s29, 4096  ;;  %p1451_p8 = scmp.lt.s32.totalorder %s1768_s29, %s1768_s29 }
  0x4d   : > { %p1444_p13 = scmp.ne.s32.totalorder %s1768_s29, %s1443_s15  ;;  %p1452_p4 = scmp.lt.s32.totalorder %s1443_s15, %s1443_s15 }
  0x4f   : > { %p1446_p1 = pnand %p1444_p13, %p1404_p9  ;;  %p1453_p3 = por %p1452_p4, %p1451_p8 }
  0x51   : > { %p1447_p2 = pneg %p1446_p1 }
  0x53   : > { %p1454_p6 = pnand %p1453_p3, %p1447_p2 }
  0x55   : > { %1457 = shalt.err (!%p1454_p6)
}
  0x56   : > { %s2128_s5 = smov 128   ;;  %s2129_s28 = smov 8  }
  0x57   : > { %1281 = dma.hbm_to_vmem [thread:$0]  (!%p1758_p5), %s2146_s3, 4096, %s1768_s29, [#allocation7], %s2128_s5, %s2128_s5, %s2129_s28  }
  0x58   : > { %s31_s8 = sadd.s32 1, %s1606_s26  ;;  %s34_s12 = sadd.s32 1, %s1610_s27 }
  0x59   : > { %p32_p9 = scmp.ge.s32.totalorder %s31_s8, 2  ;;  %s222_s30 = sand.u32 1, %s1594_s23  }
  0x5a   : > { %s1077_s14 = sshll.u32 %s1610_s27, 5  ;;  %s1076_s9 = sshll.u32 %s222_s30, 7 }
  0x5b   : > { %s2174_s8 = smov (%p32_p9, %s31_s8), 0  ;;  %s2176_s12 = smov (!%p32_p9, %s34_s12), %s1610_s27 }
  0x5c   : > { %s39_s16 = ssub.s32 %s1606_s26, %s2174_s8  ;;  %p36_p10 = scmp.ge.s32.totalorder %s2176_s12, 2 }
  0x5d   : > { %s231_s21 = sadd.s32 %s1606_s26, %s1077_s14  ;;  %s226_s15 = scalar_lea.vmem [#allocation3], %s1076_s9 }
  0x5e   : > { %s2178_s12 = smov (%p36_p10, %s2176_s12), 0  ;;  %s1078_s29 = sshll.u32 %s231_s21, 7 }
  0x5f   : > { %s234_s11 = sshll.u32 %s226_s15, 4  ;;  %s38_s6 = ssub.s32 %s1610_s27, %s2178_s12  ;;  %s1846_s11 = int_to_ptr.vmem [resolvable:$true] %s234_s11 }
  0x60   : > { %s1844_s28 = scalar_lea.hbm %s2110_s0, %s1078_s29  ;;  %s40_s1 = sor.u32 %s39_s16, %s38_s6 }
  0x61   : > { %p151_p5 = scmp.eq.s32.totalorder %s38_s6, 0  ;;  %p41_p12 = scmp.eq.s32.totalorder %s40_s1, 0 }
  0x62   : > { %s2147_s14 = sadd.s32 1, %s1582_s20  ;;  %s2148_s9 = sadd.s32 1, %s1594_s23 }
  0x63   : > { %s1851_s3 = scalar_select %p151_p5, %s1582_s20, %s2147_s14  }
  0x64   : > { %s1856_s21 = scalar_select %p41_p12, %s1594_s23, %s2148_s9  }
  0x65   : > { %s1858_s15 = scalar_lea.sflag [#allocation4], %s222_s30  ;;  %s1458_s18 = scalar_lea.hbm %s1844_s28, 2048 }
  0x66   : > { %p1459_p11 = scmp.ne.s32.totalorder %s1844_s28, %s1458_s18  ;;  %p1460_p13 = pneg %p1764_p7 }
  0x67   : > { %s1463_s16 = scalar_lea.hbm %s2110_s0, 8192  ;;  %p1464_p8 = scmp.lt.u32.totalorder %s1844_s28, %s2110_s0 }
  0x68   : > { %p1461_p1 = pnand %p1460_p13, %p1459_p11  ;;  %p1465_p4 = scmp.lt.u32.totalorder %s1463_s16, %s1458_s18 }
  0x69   : > { %p1467_p6 = scmp.lt.u32.totalorder %s1458_s18, %s1844_s28 }
  0x6a   : > { %p1462_p2 = pneg %p1461_p1  ;;  %p1466_p3 = por %p1465_p4, %p1464_p8 }
  0x6c   : > { %p1468_p9 = por %p1467_p6, %p1466_p3 }
  0x6e   : > { %p1469_p10 = pnand %p1468_p9, %p1462_p2 }
  0x70   : > { %1472 = shalt.err (!%p1469_p10)
}
  0x71   : > { %s1473_s30 = scalar_lea.vmem %s1846_s11, 2048  ;;  %s1622_s14 = smov [#allocation3]  }
  0x72   : > { %p1474_p5 = scmp.ne.s32.totalorder %s1846_s11, %s1473_s30  ;;  %s1478_s9 = sshll.u32 %s1622_s14, 4  ;;  %s1479_s9 = int_to_ptr.vmem [resolvable:$false] %s1478_s9 }
  0x73   : > { %s1480_s5 = scalar_lea.vmem %s1479_s9, 4096  ;;  %p1481_p1 = scmp.lt.s32.totalorder %s1846_s11, %s1479_s9 }
  0x74   : > { %p1476_p12 = pnand %p1474_p5, %p1460_p13  ;;  %p1482_p8 = scmp.lt.s32.totalorder %s1480_s5, %s1473_s30 }
  0x76   : > { %p1477_p11 = pneg %p1476_p12  ;;  %p1483_p4 = por %p1482_p8, %p1481_p1 }
  0x78   : > { %p1484_p3 = pnand %p1483_p4, %p1477_p11 }
  0x7a   : > { %1487 = shalt.err (!%p1484_p3)
}
  0x7b   : > { %s2149_s18 = smov 8   ;;  %s2150_s1 = smov 128  }
  0x7c   : > { %s2151_s16 = smov 256   ;;  %246 = sbr.rel (%p1747_p0) target bundleno = 1341 (0x53d), region = 40 }
  0x7d   : > { %1285 = dma.hbm_to_vmem [thread:$0]  (!%p1764_p7), %s1844_s28, 2048, %s1846_s11, %s1858_s15, %s2151_s16, %s2150_s1, %s2149_s18  }
  0x7e   : > { %s248_s29 = sand.u32 (!%p1747_p0), 1, %s1590_s22   ;;  %p2152_p13 = scmp.ne.s32.totalorder (!%p1747_p0), %s2137_s10, 0 }
  0x7f   : > { %s1080_s6 = sshll.u32 (!%p1747_p0), %s248_s29, 7  ;;  %s249_s30 = scalar_lea.sflag (!%p1747_p0), [#allocation4], %s248_s29 }
  0x80   : > { %s1892_s14 = scalar_lea.vmem (!%p1747_p0), [#allocation3], %s1080_s6 }
  0x83   : > { %1561 = dma.done.wait (%p2152_p13), %s249_s30, 2048  }
  0x84   : > { %1563 = vsyncadd (%p2152_p13), %s249_s30, 4294965248  ;;  %p2153_p2 = scmp.ne.s32.totalorder %s2135_s7, 0 }
  0x86   : > { %1565 = dma.done.wait (%p2153_p2), [#allocation7], 8192  }
  0x87   : > { %1567 = vsyncadd (%p2153_p2), [#allocation7], 4294959104  ;;  %s284_s13 = sand.u32 1, %s1578_s19   ;;  %p1083_p0 = scmp.ne.s32.totalorder %s1598_s24, 0 }
  0x88   : > { %s1905_s17 = scalar_lea.vmem [#allocation9], %s284_s13  ;;  %v1623_v0 = vmov (!%p1083_p0), 0.0  }
  0x89   : > { %289 = sbr.rel (%p1083_p0) target bundleno = 145 (0x91), region = 56  ;;  %290 = vst [vmem:[#allocation2] sm:$0xff] (!%p1083_p0), %v1623_v0  ;;  %291 = vst [vmem:[#allocation2 + $0x8] sm:$0xff] (!%p1083_p0), %v1623_v0 }
  0x8a   : > { %292 = vst [vmem:[#allocation2 + $0x10] sm:$0xff] (!%p1083_p0), %v1623_v0  ;;  %293 = vst [vmem:[#allocation2 + $0x18] sm:$0xff] (!%p1083_p0), %v1623_v0 }
  0x8b   : > { %294 = vst [vmem:[#allocation2 + $0x20] sm:$0xff] (!%p1083_p0), %v1623_v0  ;;  %295 = vst [vmem:[#allocation2 + $0x28] sm:$0xff] (!%p1083_p0), %v1623_v0 }
  0x8c   : > { %296 = vst [vmem:[#allocation2 + $0x30] sm:$0xff] (!%p1083_p0), %v1623_v0  ;;  %297 = vst [vmem:[#allocation2 + $0x38] sm:$0xff] (!%p1083_p0), %v1623_v0 }
  0x8d   : > { %298 = vst [vmem:[#allocation2 + $0x40] sm:$0xff] (!%p1083_p0), %v1623_v0  ;;  %299 = vst [vmem:[#allocation2 + $0x48] sm:$0xff] (!%p1083_p0), %v1623_v0 }
  0x8e   : > { %300 = vst [vmem:[#allocation2 + $0x50] sm:$0xff] (!%p1083_p0), %v1623_v0  ;;  %301 = vst [vmem:[#allocation2 + $0x58] sm:$0xff] (!%p1083_p0), %v1623_v0 }
  0x8f   : > { %302 = vst [vmem:[#allocation2 + $0x60] sm:$0xff] (!%p1083_p0), %v1623_v0  ;;  %303 = vst [vmem:[#allocation2 + $0x68] sm:$0xff] (!%p1083_p0), %v1623_v0 }
  0x90   : > { %304 = vst [vmem:[#allocation2 + $0x70] sm:$0xff] %v1623_v0  ;;  %305 = vst [vmem:[#allocation2 + $0x78] sm:$0xff] %v1623_v0 }
  0x91 PF: > { %v306_v1 = vld [vmem:[#allocation2] sm:$0xff]  ;;  %v307_v3 = vld [vmem:[#allocation2 + $0x8] sm:$0xff]  ;;  %v324_v7 = vld [vmem:[%s1892_s14 + $0x10] sm:$0xff]  ;;  %p1084_p7 = scmp.ne.s32.totalorder %s1598_s24, 1 }
  0x92   : > { %v322_v2 = vld [vmem:[%s1892_s14] sm:$0xff]  ;;  %v323_v5 = vld [vmem:[%s1892_s14 + $0x8] sm:$0xff]  ;;  %v308_v6 = vld [vmem:[#allocation2 + $0x10] sm:$0xff]  ;;  %vm498_vm0 = vcmask (!%p1084_p7), 130112   ;;  %vm505_vm1 = vcmask (!%p1084_p7), 195712   ;;  %vm512_vm2 = vcmask (!%p1084_p7), 261312  }
  0x93   : > { %v338_v4 = vadd.f32 %v322_v2, %v306_v1  ;;  %v339_v8 = vadd.f32 %v323_v5, %v307_v3  ;;  %v340_v9 = vadd.f32 %v324_v7, %v308_v6  ;;  %v309_v10 = vld [vmem:[#allocation2 + $0x18] sm:$0xff]  ;;  %v310_v12 = vld [vmem:[#allocation2 + $0x20] sm:$0xff]  ;;  %v311_v15 = vld [vmem:[#allocation2 + $0x28] sm:$0xff]  ;;  %vm519_vm3 = vcmask (!%p1084_p7), 326912  }
  0x94   : > { %v325_v11 = vld [vmem:[%s1892_s14 + $0x18] sm:$0xff]  ;;  %v326_v14 = vld [vmem:[%s1892_s14 + $0x20] sm:$0xff]  ;;  %v327_v16 = vld [vmem:[%s1892_s14 + $0x28] sm:$0xff]  ;;  %vm526_vm4 = vcmask (!%p1084_p7), 392512   ;;  %vm533_vm5 = vcmask (!%p1084_p7), 458112   ;;  %vm540_vm6 = vcmask (!%p1084_p7), 523712  }
  0x95   : > { %354 = vst [vmem:[#allocation2] sm:$0xff] %v338_v4  ;;  %v341_v13 = vadd.f32 %v325_v11, %v309_v10  ;;  %355 = vst [vmem:[#allocation2 + $0x8] sm:$0xff] %v339_v8  ;;  %v342_v17 = vadd.f32 %v326_v14, %v310_v12  ;;  %v343_v18 = vadd.f32 %v327_v16, %v311_v15  ;;  %v312_v19 = vld [vmem:[#allocation2 + $0x30] sm:$0xff]  ;;  %v313_v21 = vld [vmem:[#allocation2 + $0x38] sm:$0xff]  ;;  %vm547_vm7 = vcmask (!%p1084_p7), 589312  }
  0x96   : > { %356 = vst [vmem:[#allocation2 + $0x10] sm:$0xff] %v340_v9  ;;  %v328_v20 = vld [vmem:[%s1892_s14 + $0x30] sm:$0xff]  ;;  %v329_v23 = vld [vmem:[%s1892_s14 + $0x38] sm:$0xff]  ;;  %v314_v24 = vld [vmem:[#allocation2 + $0x40] sm:$0xff]  ;;  %vm554_vm8 = vcmask (!%p1084_p7), 654912   ;;  %vm561_vm9 = vcmask (!%p1084_p7), 720512  }
  0x97   : > { %357 = vst [vmem:[#allocation2 + $0x18] sm:$0xff] %v341_v13  ;;  %v344_v22 = vadd.f32 %v328_v20, %v312_v19  ;;  %v330_v25 = vld [vmem:[%s1892_s14 + $0x40] sm:$0xff]  ;;  %358 = vst [vmem:[#allocation2 + $0x20] sm:$0xff] %v342_v17  ;;  %v345_v26 = vadd.f32 %v329_v23, %v313_v21  ;;  %v315_v28 = vld [vmem:[#allocation2 + $0x48] sm:$0xff]  ;;  %vm568_vm10 = vcmask (!%p1084_p7), 786112   ;;  %vm575_vm11 = vcmask (!%p1084_p7), 851712  }
  0x98   : > { %359 = vst [vmem:[#allocation2 + $0x28] sm:$0xff] %v343_v18  ;;  %v346_v27 = vadd.f32 %v330_v25, %v314_v24  ;;  %v331_v29 = vld [vmem:[%s1892_s14 + $0x48] sm:$0xff]  ;;  %v316_v30 = vld [vmem:[#allocation2 + $0x50] sm:$0xff]  ;;  %v317_v33 = vld [vmem:[#allocation2 + $0x58] sm:$0xff]  ;;  %vm582_vm12 = vcmask (!%p1084_p7), 917312   ;;  %vm589_vm13 = vcmask (!%p1084_p7), 982912  }
  0x99   : > { %360 = vst [vmem:[#allocation2 + $0x30] sm:$0xff] %v344_v22  ;;  %v347_v31 = vadd.f32 %v331_v29, %v315_v28  ;;  %v332_v32 = vld [vmem:[%s1892_s14 + $0x50] sm:$0xff]  ;;  %v333_v34 = vld [vmem:[%s1892_s14 + $0x58] sm:$0xff]  ;;  %361 = vst [vmem:[#allocation2 + $0x38] sm:$0xff] %v345_v26  ;;  %vm596_vm14 = vcmask (!%p1084_p7), 1048512   ;;  %vm794_vm15 = vcmask (!%p1084_p7), 1040384  }
  0x9a   : > { %362 = vst [vmem:[#allocation2 + $0x40] sm:$0xff] %v346_v27  ;;  %v348_v35 = vadd.f32 %v332_v32, %v316_v30  ;;  %v349_v36 = vadd.f32 %v333_v34, %v317_v33  ;;  %v318_v37 = vld [vmem:[#allocation2 + $0x60] sm:$0xff]  ;;  %v319_v39 = vld [vmem:[#allocation2 + $0x68] sm:$0xff]  ;;  %v320_v42 = vld [vmem:[#allocation2 + $0x70] sm:$0xff]  ;;  %373 = sbr.rel (%p1084_p7) target bundleno = 1314 (0x522), region = 60 }
  0x9b   : > { %v334_v38 = vld [vmem:[%s1892_s14 + $0x60] sm:$0xff]  ;;  %363 = vst [vmem:[#allocation2 + $0x48] sm:$0xff] %v347_v31  ;;  %v335_v41 = vld [vmem:[%s1892_s14 + $0x68] sm:$0xff]  ;;  %v336_v43 = vld [vmem:[%s1892_s14 + $0x70] sm:$0xff] }
  0x9c   : > { %v350_v40 = vadd.f32 %v334_v38, %v318_v37  ;;  %364 = vst [vmem:[#allocation2 + $0x50] sm:$0xff] %v348_v35  ;;  %365 = vst [vmem:[#allocation2 + $0x58] sm:$0xff] %v349_v36  ;;  %v351_v44 = vadd.f32 %v335_v41, %v319_v39  ;;  %v352_v45 = vadd.f32 %v336_v43, %v320_v42  ;;  %v321_v46 = vld [vmem:[#allocation2 + $0x78] sm:$0xff]  ;;  %v374_v49 = vld [vmem:[#allocation2] sm:$0xff] (!%p1084_p7) }
  0x9d   : > { %v337_v47 = vld [vmem:[%s1892_s14 + $0x78] sm:$0xff]  ;;  %v376_v50 = vld [vmem:[#allocation2 + $0x10] sm:$0xff] (!%p1084_p7)  ;;  %390 = vadd.xlane.f32.xlu0 (!%p1084_p7), %v374_v49  ;;  %v375_v51 = vld [vmem:[#allocation2 + $0x8] sm:$0xff] (!%p1084_p7)  ;;  %v1624_v49 = vmov (!%p1084_p7), 0.0  }
  0x9e   : > { %366 = vst [vmem:[#allocation2 + $0x60] sm:$0xff] %v350_v40  ;;  %v353_v48 = vadd.f32 %v337_v47, %v321_v46  ;;  %367 = vst [vmem:[#allocation2 + $0x68] sm:$0xff] %v351_v44  ;;  %394 = vadd.xlane.f32.xlu1 (!%p1084_p7), %v376_v50  ;;  %v377_v52 = vld [vmem:[#allocation2 + $0x18] sm:$0xff] (!%p1084_p7)  ;;  %v378_v53 = vld [vmem:[#allocation2 + $0x20] sm:$0xff] (!%p1084_p7)  ;;  %674 = vmatprep.mubr.f32.mxu0 (!%p1084_p7), %v1624_v49 }
  0x9f   : > { %368 = vst [vmem:[#allocation2 + $0x70] sm:$0xff] %v352_v45  ;;  %v379_v54 = vld [vmem:[#allocation2 + $0x28] sm:$0xff] (!%p1084_p7)  ;;  %v441_v60 = vld [vmem:[#allocation6 + $0x18] sm:$0xff] (!%p1084_p7)  ;;  %v438_v62 = vld [vmem:[#allocation6] sm:$0xff] (!%p1084_p7) }
  0xa0   : > { %369 = vst [vmem:[#allocation2 + $0x78] sm:$0xff] %v353_v48  ;;  %v380_v55 = vld [vmem:[#allocation2 + $0x30] sm:$0xff] (!%p1084_p7)  ;;  %v381_v56 = vld [vmem:[#allocation2 + $0x38] sm:$0xff] (!%p1084_p7)  ;;  %v439_v59 = vld [vmem:[#allocation6 + $0x8] sm:$0xff] (!%p1084_p7) }
  0xa1   : > { %392 = vadd.xlane.f32.xlu0 %v375_v51  ;;  %v382_v57 = vld [vmem:[#allocation2 + $0x40] sm:$0xff]  ;;  %v1175_v61 = vpack.c.bf16 %v441_v60, %v439_v59  ;;  %v440_v63 = vld [vmem:[#allocation6 + $0x10] sm:$0xff]  ;;  %v443_v3 = vld [vmem:[#allocation6 + $0x28] sm:$0xff] }
  0xa2   : > { %396 = vadd.xlane.f32.xlu1 %v377_v52  ;;  %v383_v58 = vld [vmem:[#allocation2 + $0x48] sm:$0xff]  ;;  %v1177_v0 = vpack.c.bf16 %v440_v63, %v438_v62  ;;  %v445_v4 = vld [vmem:[#allocation6 + $0x38] sm:$0xff]  ;;  %v442_v6 = vld [vmem:[#allocation6 + $0x20] sm:$0xff] }
  0xa3   : > { %v384_v1 = vld [vmem:[#allocation2 + $0x50] sm:$0xff]  ;;  %v385_v2 = vld [vmem:[#allocation2 + $0x58] sm:$0xff]  ;;  %1176 = vmatprep.subr.bf16.mxu0 %v1175_v61  ;;  %v1179_v5 = vpack.c.bf16 %v445_v4, %v443_v3  ;;  %v447_v11 = vld [vmem:[#allocation6 + $0x48] sm:$0xff]  ;;  %v487_v4 = vlaneseq }
  0xa4   : > { %1178 = vmatpush1.bf16.msra.mxu0 %v1177_v0  ;;  %v444_v7 = vld [vmem:[#allocation6 + $0x30] sm:$0xff]  ;;  %v449_v12 = vld [vmem:[#allocation6 + $0x58] sm:$0xff]  ;;  %v446_v14 = vld [vmem:[#allocation6 + $0x40] sm:$0xff] }
  0xa5   : > { %398 = vadd.xlane.f32.xlu0 %v378_v53  ;;  %v1181_v8 = vpack.c.bf16 %v444_v7, %v442_v6  ;;  %v386_v9 = vld [vmem:[#allocation2 + $0x60] sm:$0xff]  ;;  %v387_v10 = vld [vmem:[#allocation2 + $0x68] sm:$0xff]  ;;  %1180 = vmatprep.subr.bf16.mxu0 %v1179_v5  ;;  %v1183_v13 = vpack.c.bf16 %v449_v12, %v447_v11  ;;  %v448_v15 = vld [vmem:[#allocation6 + $0x50] sm:$0xff]  ;;  %v1926_v5 = vand.u32 127, %v487_v4  ;;  %v1928_v6 = vshrl.u32 %v487_v4, 7 }
  0xa6   : > { %400 = vadd.xlane.f32.xlu1 %v379_v54  ;;  %v1185_v16 = vpack.c.bf16 %v448_v15, %v446_v14  ;;  %v388_v17 = vld [vmem:[#allocation2 + $0x70] sm:$0xff]  ;;  %v451_v19 = vld [vmem:[#allocation6 + $0x68] sm:$0xff]  ;;  %v453_v20 = vld [vmem:[#allocation6 + $0x78] sm:$0xff] }
  0xa7   : > { %v389_v18 = vld [vmem:[#allocation2 + $0x78] sm:$0xff]  ;;  %v1187_v21 = vpack.c.bf16 %v453_v20, %v451_v19  ;;  %v450_v22 = vld [vmem:[#allocation6 + $0x60] sm:$0xff]  ;;  %v452_v23 = vld [vmem:[#allocation6 + $0x70] sm:$0xff]  ;;  %v493_v7 = vadd.s32 4294967288, %v1926_v5  ;;  %v514_v12 = vadd.s32 4294967264, %v1926_v5 }
  0xa8   : > { %1182 = vmatpush1.bf16.msra.mxu0 %v1181_v8  ;;  %v1189_v24 = vpack.c.bf16 %v452_v23, %v450_v22  ;;  %v455_v25 = vld [vmem:[#allocation6 + $0x88] sm:$0xff]  ;;  %v457_v26 = vld [vmem:[#allocation6 + $0x98] sm:$0xff]  ;;  %v454_v28 = vld [vmem:[#allocation6 + $0x80] sm:$0xff]  ;;  %v507_v8 = vadd.s32 4294967272, %v1926_v5 }
  0xa9   : > { %402 = vadd.xlane.f32.xlu0 %v380_v55  ;;  %1184 = vmatprep.subr.bf16.mxu0 %v1183_v13  ;;  %v1191_v27 = vpack.c.bf16 %v457_v26, %v455_v25  ;;  %v456_v29 = vld [vmem:[#allocation6 + $0x90] sm:$0xff]  ;;  %v459_v31 = vld [vmem:[#allocation6 + $0xa8] sm:$0xff]  ;;  %v461_v32 = vld [vmem:[#allocation6 + $0xb8] sm:$0xff]  ;;  %v491_v13 = vsub.s32 %v1926_v5, %v1928_v6  ;;  %v496_v15 = vsub.s32 %v493_v7, %v1928_v6 }
  0xaa   : > { %404 = vadd.xlane.f32.xlu1 %v381_v56  ;;  %v1193_v30 = vpack.c.bf16 %v456_v29, %v454_v28  ;;  %v1195_v33 = vpack.c.bf16 %v461_v32, %v459_v31  ;;  %v458_v34 = vld [vmem:[#allocation6 + $0xa0] sm:$0xff]  ;;  %v460_v35 = vld [vmem:[#allocation6 + $0xb0] sm:$0xff]  ;;  %v463_v37 = vld [vmem:[#allocation6 + $0xc8] sm:$0xff]  ;;  %v528_v28 = vadd.s32 4294967248, %v1926_v5 }
  0xab   : > { %v1197_v36 = vpack.c.bf16 %v460_v35, %v458_v34  ;;  %v465_v38 = vld [vmem:[#allocation6 + $0xd8] sm:$0xff]  ;;  %v462_v40 = vld [vmem:[#allocation6 + $0xc0] sm:$0xff]  ;;  %v464_v41 = vld [vmem:[#allocation6 + $0xd0] sm:$0xff] }
  0xac   : > { %1186 = vmatpush1.bf16.msra.mxu0 %v1185_v16  ;;  %v1199_v39 = vpack.c.bf16 %v465_v38, %v463_v37  ;;  %v1201_v42 = vpack.c.bf16 %v464_v41, %v462_v40  ;;  %v467_v43 = vld [vmem:[#allocation6 + $0xe8] sm:$0xff]  ;;  %v469_v44 = vld [vmem:[#allocation6 + $0xf8] sm:$0xff]  ;;  %v466_v46 = vld [vmem:[#allocation6 + $0xe0] sm:$0xff]  ;;  %v510_v16 = vsub.s32 %v507_v8, %v1928_v6  ;;  %v531_v40 = vsub.s32 %v528_v28, %v1928_v6 }
  0xad   : > { %406 = vadd.xlane.f32.xlu0 %v382_v57  ;;  %1188 = vmatprep.subr.bf16.mxu0 %v1187_v21  ;;  %v1203_v45 = vpack.c.bf16 %v469_v44, %v467_v43  ;;  %v468_v47 = vld [vmem:[#allocation6 + $0xf0] sm:$0xff]  ;;  %v707_v50 = vld [vmem:[#allocation8 + $0x80] sm:$0xff]  ;;  %v708_v51 = vld [vmem:[#allocation8 + $0x88] sm:$0xff]  ;;  %v521_v21 = vadd.s32 4294967256, %v1926_v5  ;;  %v542_v41 = vadd.s32 4294967232, %v1926_v5 }
  0xae   : > { %408 = vadd.xlane.f32.xlu1 %v383_v58  ;;  %v1205_v48 = vpack.c.bf16 %v468_v47, %v466_v46  ;;  %v691_v52 = vld [vmem:[#allocation8] sm:$0xff]  ;;  %v1207_v53 = vpack.c.bf16 %v708_v51, %v707_v50  ;;  %v692_v54 = vld [vmem:[#allocation8 + $0x8] sm:$0xff]  ;;  %v709_v55 = vld [vmem:[#allocation8 + $0x90] sm:$0xff]  ;;  %v549_v46 = vadd.s32 4294967224, %v1926_v5 }
  0xaf   : > { %v710_v56 = vld [vmem:[#allocation8 + $0x98] sm:$0xff]  ;;  %v1209_v57 = vpack.c.bf16 %v692_v54, %v691_v52  ;;  %v693_v59 = vld [vmem:[#allocation8 + $0x10] sm:$0xff]  ;;  %v711_v61 = vld [vmem:[#allocation8 + $0xa0] sm:$0xff]  ;;  %v524_v31 = vsub.s32 %v521_v21, %v1928_v6  ;;  %v545_v52 = vsub.s32 %v542_v41, %v1928_v6 }
  0xb0   : > { %1190 = vmatpush1.bf16.msra.mxu0 %v1189_v24  ;;  %v1211_v58 = vpack.c.bf16 %v710_v56, %v709_v55  ;;  %v694_v60 = vld [vmem:[#allocation8 + $0x18] sm:$0xff]  ;;  %1208 = vmatprep.subr.bf16.mxu1 %v1207_v53  ;;  %v712_v62 = vld [vmem:[#allocation8 + $0xa8] sm:$0xff]  ;;  %v517_v24 = vsub.s32 %v514_v12, %v1928_v6  ;;  %v556_v53 = vadd.s32 4294967216, %v1926_v5 }
  0xb1   : > { %410 = vadd.xlane.f32.xlu0 %v384_v1  ;;  %1192 = vmatprep.subr.bf16.mxu0 %v1191_v27  ;;  %v1213_v63 = vpack.c.bf16 %v694_v60, %v693_v59  ;;  %v1215_v0 = vpack.c.bf16 %v712_v62, %v711_v61  ;;  %v695_v1 = vld [vmem:[#allocation8 + $0x20] sm:$0xff]  ;;  %v563_v59 = vadd.s32 4294967208, %v1926_v5  ;;  %v714_v41 = vld [vmem:[#allocation8 + $0xb8] sm:$0xff] }
  0xb2   : > { %412 = vadd.xlane.f32.xlu1 %v385_v2  ;;  %1210 = vmatpush3.bf16.msra.mxu1 %v1209_v57  ;;  %v696_v2 = vld [vmem:[#allocation8 + $0x28] sm:$0xff]  ;;  %v552_v57 = vsub.s32 %v549_v46, %v1928_v6  ;;  %v715_v46 = vld [vmem:[#allocation8 + $0xc0] sm:$0xff] }
  0xb3   : > { %1212 = vmatprep.subr.bf16.mxu1 %v1211_v58  ;;  %v1217_v3 = vpack.c.bf16 %v696_v2, %v695_v1  ;;  %v570_v1 = vadd.s32 4294967200, %v1926_v5  ;;  %v566_v7 = vsub.s32 %v563_v59, %v1928_v6  ;;  %v719_v59 = vld [vmem:[#allocation8 + $0xe0] sm:$0xff] }
  0xb4   : > { %1194 = vmatpush1.bf16.msra.mxu0 %v1193_v30 }
  0xb5   : > { %414 = vadd.xlane.f32.xlu0 %v386_v9  ;;  %1196 = vmatprep.subr.bf16.mxu0 %v1195_v33  ;;  %v535_v33 = vadd.s32 4294967240, %v1926_v5 }
  0xb6   : > { %416 = vadd.xlane.f32.xlu1 %v387_v10  ;;  %1214 = vmatpush3.bf16.msra.mxu1 %v1213_v63  ;;  %v500_v10 = vadd.s32 4294967280, %v1926_v5 }
  0xb7   : > { %1216 = vmatprep.subr.bf16.mxu1 %v1215_v0  ;;  %v538_v44 = vsub.s32 %v535_v33, %v1928_v6  ;;  %v559_v0 = vsub.s32 %v556_v53, %v1928_v6  ;;  %v717_v53 = vld [vmem:[#allocation8 + $0xd0] sm:$0xff] }
  0xb8   : > { %1198 = vmatpush1.bf16.msra.mxu0 %v1197_v36 }
  0xb9   : > { %418 = vadd.xlane.f32.xlu0 %v388_v17  ;;  %1200 = vmatprep.subr.bf16.mxu0 %v1199_v39  ;;  %v503_v17 = vsub.s32 %v500_v10, %v1928_v6 }
  0xba   : > { %420 = vadd.xlane.f32.xlu1 %v389_v18  ;;  %1218 = vmatpush3.bf16.msra.mxu1 %v1217_v3 }
  0xbc   : > { %1202 = vmatpush1.bf16.msra.mxu0 %v1201_v42 }
  0xbd   : > { %1204 = vmatprep.subr.bf16.mxu0 %v1203_v45 }
  0xc0   : > { %1206 = vmatpush1.bf16.msra.mxu0 %v1205_v48 }
 0x12a   : > { %v391_v9 = vpop.xlane.xlu0 %390 }
 0x12b   : > { %v395_v11 = vpop.xlane.xlu1 %394  ;;  %v422_v14 = vmul.f32 0.00390625, %v391_v9  ;;  %v577_v9 = vadd.s32 4294967192, %v1926_v5 }
 0x12c   : > { %v424_v18 = vmul.f32 0.00390625, %v395_v11 }
 0x12d   : > { %v492_v25 = vrot.slane %v422_v14, %v491_v13  ;;  %v573_v14 = vsub.s32 %v570_v1, %v1928_v6  ;;  %v721_v1 = vld [vmem:[#allocation8 + $0xf0] sm:$0xff] }
 0x12e   : > { %v393_v19 = vpop.xlane.xlu0 %392  ;;  %v504_v29 = vrot.slane %v424_v18, %v503_v17 }
 0x12f   : > { %v397_v20 = vpop.xlane.xlu1 %396  ;;  %v423_v22 = vmul.f32 0.00390625, %v393_v19 }
 0x130   : > { %v425_v23 = vmul.f32 0.00390625, %v397_v20  ;;  %v580_v20 = vsub.s32 %v577_v9, %v1928_v6  ;;  %v602_v9 = vsub.s32 0, %v1928_v6 }
 0x131   : > { %v497_v26 = vrot.slane %v423_v22, %v496_v15  ;;  %v584_v15 = vadd.s32 4294967184, %v1926_v5 }
 0x132   : > { %v511_v27 = vrot.slane %v425_v23, %v510_v16  ;;  %v399_v30 = vpop.xlane.xlu0 %398  ;;  %v591_v16 = vadd.s32 4294967176, %v1926_v5 }
 0x133   : > { %v401_v32 = vpop.xlane.xlu1 %400  ;;  %v499_v34 = vsel %vm498_vm0, %v497_v26, %v492_v25  ;;  %v426_v35 = vmul.f32 0.00390625, %v399_v30  ;;  %v587_v26 = vsub.s32 %v584_v15, %v1928_v6  ;;  %vm824_vm0 = vcmp.lt.s32.totalorder %v1928_v6, %v1926_v5 }
 0x134   : > { %v427_v36 = vmul.f32 0.00390625, %v401_v32  ;;  %v506_v37 = vsel %vm505_vm1, %v504_v29, %v499_v34  ;;  %vm840_vm1 = vcmp.eq.s32.totalorder %v1928_v6, %v1926_v5 }
 0x135   : > { %v513_v38 = vsel %vm512_vm2, %v511_v27, %v506_v37  ;;  %v518_v39 = vrot.slane %v426_v35, %v517_v24  ;;  %v594_v27 = vsub.s32 %v591_v16, %v1928_v6 }
 0x136   : > { %v525_v42 = vrot.slane %v427_v36, %v524_v31  ;;  %v403_v43 = vpop.xlane.xlu0 %402 }
 0x137   : > { %v405_v45 = vpop.xlane.xlu1 %404  ;;  %v520_v47 = vsel %vm519_vm3, %v518_v39, %v513_v38  ;;  %v428_v48 = vmul.f32 0.00390625, %v403_v43  ;;  %v697_v43 = vld [vmem:[#allocation8 + $0x30] sm:$0xff] }
 0x138   : > { %v429_v50 = vmul.f32 0.00390625, %v405_v45  ;;  %v527_v54 = vsel %vm526_vm4, %v525_v42, %v520_v47  ;;  %v716_v47 = vld [vmem:[#allocation8 + $0xc8] sm:$0xff] }
 0x139   : > { %v532_v51 = vrot.slane %v428_v48, %v531_v40  ;;  %v713_v40 = vld [vmem:[#allocation8 + $0xb0] sm:$0xff]  ;;  %v1223_v48 = vpack.c.bf16 %v716_v47, %v715_v46 }
 0x13a   : > { %v539_v55 = vrot.slane %v429_v50, %v538_v44  ;;  %v407_v56 = vpop.xlane.xlu0 %406  ;;  %v1219_v42 = vpack.c.bf16 %v714_v41, %v713_v40  ;;  %v698_v44 = vld [vmem:[#allocation8 + $0x38] sm:$0xff]  ;;  %v699_v50 = vld [vmem:[#allocation8 + $0x40] sm:$0xff]  ;;  %v813_v41 = vadd.s32 40, %v1928_v6 }
 0x13b   : > { %v409_v58 = vpop.xlane.xlu1 %408  ;;  %v534_v60 = vsel %vm533_vm5, %v532_v51, %v527_v54  ;;  %v430_v61 = vmul.f32 0.00390625, %v407_v56  ;;  %v1221_v45 = vpack.c.bf16 %v698_v44, %v697_v43  ;;  %v700_v51 = vld [vmem:[#allocation8 + $0x48] sm:$0xff]  ;;  %v718_v54 = vld [vmem:[#allocation8 + $0xd8] sm:$0xff]  ;;  %v701_v56 = vld [vmem:[#allocation8 + $0x50] sm:$0xff] }
 0x13c   : > { %v431_v62 = vmul.f32 0.00390625, %v409_v58  ;;  %v541_v2 = vsel %vm540_vm6, %v539_v55, %v534_v60  ;;  %1220 = vmatprep.subr.bf16.mxu1 %v1219_v42  ;;  %v1227_v55 = vpack.c.bf16 %v718_v54, %v717_v53  ;;  %v720_v60 = vld [vmem:[#allocation8 + $0xe8] sm:$0xff]  ;;  %v815_v54 = vadd.s32 56, %v1928_v6 }
 0x13d   : > { %v546_v63 = vrot.slane %v430_v61, %v545_v52  ;;  %1222 = vmatpush3.bf16.msra.mxu1 %v1221_v45  ;;  %v1225_v52 = vpack.c.bf16 %v700_v51, %v699_v50  ;;  %v1231_v61 = vpack.c.bf16 %v720_v60, %v719_v59  ;;  %v814_v50 = vadd.s32 48, %v1928_v6 }
 0x13e   : > { %v553_v3 = vrot.slane %v431_v62, %v552_v57  ;;  %v411_v4 = vpop.xlane.xlu0 %410  ;;  %1224 = vmatprep.subr.bf16.mxu1 %v1223_v48  ;;  %v702_v57 = vld [vmem:[#allocation8 + $0x58] sm:$0xff]  ;;  %v703_v62 = vld [vmem:[#allocation8 + $0x60] sm:$0xff] }
 0x13f   : > { %v413_v8 = vpop.xlane.xlu1 %412  ;;  %v548_v10 = vsel %vm547_vm7, %v546_v63, %v541_v2  ;;  %v432_v11 = vmul.f32 0.00390625, %v411_v4  ;;  %v1229_v58 = vpack.c.bf16 %v702_v57, %v701_v56  ;;  %v704_v63 = vld [vmem:[#allocation8 + $0x68] sm:$0xff]  ;;  %v722_v2 = vld [vmem:[#allocation8 + $0xf8] sm:$0xff]  ;;  %v705_v4 = vld [vmem:[#allocation8 + $0x70] sm:$0xff] }
 0x140   : > { %v433_v12 = vmul.f32 0.00390625, %v413_v8  ;;  %v555_v17 = vsel %vm554_vm8, %v553_v3, %v548_v10  ;;  %v1235_v3 = vpack.c.bf16 %v722_v2, %v721_v1  ;;  %v470_v10 = vld [vmem:[%s2112_s2] sm:$0x3] }
 0x141   : > { %v560_v13 = vrot.slane %v432_v11, %v559_v0  ;;  %1226 = vmatpush3.bf16.msra.mxu1 %v1225_v52  ;;  %v1233_v0 = vpack.c.bf16 %v704_v63, %v703_v62  ;;  %v606_v11 = vsub.s32 1, %v1928_v6 }
 0x142   : > { %v567_v18 = vrot.slane %v433_v12, %v566_v7  ;;  %v415_v19 = vpop.xlane.xlu0 %414  ;;  %1228 = vmatprep.subr.bf16.mxu1 %v1227_v55  ;;  %v706_v7 = vld [vmem:[#allocation8 + $0x78] sm:$0xff]  ;;  %v603_v12 = vrot.slane %v470_v10, %v602_v9 }
 0x143   : > { %v417_v21 = vpop.xlane.xlu1 %416  ;;  %v562_v22 = vsel %vm561_vm9, %v560_v13, %v555_v17  ;;  %v434_v23 = vmul.f32 0.00390625, %v415_v19  ;;  %v1237_v8 = vpack.c.bf16 %v706_v7, %v705_v4  ;;  %v607_v13 = vrot.slane %v470_v10, %v606_v11 }
 0x144   : > { %v435_v24 = vmul.f32 0.00390625, %v417_v21  ;;  %v569_v28 = vsel %vm568_vm10, %v567_v18, %v562_v22  ;;  %vm829_vm9 = vcmp.lt.s32.totalorder %v813_v41, %v1926_v5  ;;  %v816_v4 = vadd.s32 64, %v1928_v6 }
 0x145   : > { %v574_v25 = vrot.slane %v434_v23, %v573_v14  ;;  %1230 = vmatpush3.bf16.msra.mxu1 %v1229_v58  ;;  %v817_v7 = vadd.s32 72, %v1928_v6 }
 0x146   : > { %v581_v29 = vrot.slane %v435_v24, %v580_v20  ;;  %v419_v30 = vpop.xlane.xlu0 %418  ;;  %1232 = vmatprep.subr.bf16.mxu1 %v1231_v61 }
 0x147   : > { %v421_v31 = vpop.xlane.xlu1 %420  ;;  %v576_v32 = vsel %vm575_vm11, %v574_v25, %v569_v28  ;;  %v436_v33 = vmul.f32 0.00390625, %v419_v30  ;;  %v723_v30 = vld [vmem:[%s2114_s4] sm:$0x1]  ;;  %vm845_vm11 = vcmp.eq.s32.totalorder %v813_v41, %v1926_v5 }
 0x148   : > { %v437_v34 = vmul.f32 0.00390625, %v421_v31  ;;  %v583_v37 = vsel %vm582_vm12, %v581_v29, %v576_v32  ;;  %v861_v53 = vsel %vm845_vm11, 0.5, %v1624_v49  ;;  %vm846_vm12 = vcmp.eq.s32.totalorder %v814_v50, %v1926_v5 }
 0x149   : > { %v588_v35 = vrot.slane %v436_v33, %v587_v26  ;;  %1234 = vmatpush3.bf16.msra.mxu1 %v1233_v0  ;;  %v877_v56 = vsel %vm829_vm9, 1.0, %v861_v53  ;;  %v862_v57 = vsel %vm846_vm12, 0.5, %v1624_v49  ;;  %vm1626_vm12 = vmmov 0  }
 0x14a   : > { %v595_v36 = vrot.slane %v437_v34, %v594_v27  ;;  %1236 = vmatprep.subr.bf16.mxu1 %v1235_v3  ;;  %v809_v34 = vadd.s32 8, %v1928_v6 }
 0x14b   : > { %v590_v38 = vsel %vm589_vm13, %v588_v35, %v583_v37  ;;  %v1625_v35 = vmov 0.0|0.0   ;;  %v810_v37 = vadd.s32 16, %v1928_v6  ;;  %vm830_vm13 = vcmp.lt.s32.totalorder %v814_v50, %v1926_v5 }
 0x14c   : > { %v597_v39 = vsel %vm596_vm14, %v595_v36, %v590_v38  ;;  %1239 = vmatprep.subr.bf16.mxu0 %v1625_v35  ;;  %v856_v36 = vsel %vm840_vm1, 0.5, %v1624_v49  ;;  %v811_v38 = vadd.s32 24, %v1928_v6  ;;  %vm825_vm2 = vcmp.lt.s32.totalorder %v809_v34, %v1926_v5 }
 0x14d   : > { %675 = vmatmul.mubr.f32.vlgmr.msra.gmra.mrb[0].mxu0 %v597_v39  ;;  %1238 = vmatpush3.bf16.msra.mxu1 %v1237_v8  ;;  %v812_v39 = vadd.s32 32, %v1928_v6  ;;  %vm841_vm3 = vcmp.eq.s32.totalorder %v809_v34, %v1926_v5  ;;  %v872_v40 = vsel %vm824_vm0, 1.0, %v856_v36  ;;  %vm826_vm4 = vcmp.lt.s32.totalorder %v810_v37, %v1926_v5 }
 0x14e   : > { %v857_v42 = vsel %vm841_vm3, 0.5, %v1624_v49  ;;  %vm827_vm5 = vcmp.lt.s32.totalorder %v811_v38, %v1926_v5  ;;  %vm842_vm6 = vcmp.eq.s32.totalorder %v810_v37, %v1926_v5  ;;  %vm843_vm7 = vcmp.eq.s32.totalorder %v811_v38, %v1926_v5  ;;  %1172 = vmatprep.mubr.msk.f32.mxu0 %vm1626_vm12, %v1624_v49 }
 0x14f   : > { %v873_v43 = vsel %vm825_vm2, 1.0, %v857_v42  ;;  %v858_v44 = vsel %vm842_vm6, 0.5, %v1624_v49  ;;  %vm828_vm8 = vcmp.lt.s32.totalorder %v812_v39, %v1926_v5  ;;  %v859_v46 = vsel %vm843_vm7, 0.5, %v1624_v49 }
 0x150   : > { %v1240_v45 = vpack.c.bf16 %v873_v43, %v872_v40  ;;  %v874_v47 = vsel %vm826_vm4, 1.0, %v858_v44  ;;  %v875_v48 = vsel %vm827_vm5, 1.0, %v859_v46  ;;  %vm844_vm10 = vcmp.eq.s32.totalorder %v812_v39, %v1926_v5 }
 0x151   : > { %v1243_v51 = vpack.c.bf16 %v875_v48, %v874_v47  ;;  %v860_v52 = vsel %vm844_vm10, 0.5, %v1624_v49  ;;  %vm831_vm14 = vcmp.lt.s32.totalorder %v815_v54, %v1926_v5  ;;  %vm847_vm0 = vcmp.eq.s32.totalorder %v815_v54, %v1926_v5 }
 0x152   : > { %1241 = vmatpush3.bf16.msra.mxu0 %v1240_v45  ;;  %v876_v55 = vsel %vm828_vm8, 1.0, %v860_v52  ;;  %v863_v58 = vsel %vm847_vm0, 0.5, %v1624_v49  ;;  %v878_v60 = vsel %vm830_vm13, 1.0, %v862_v57  ;;  %vm848_vm1 = vcmp.eq.s32.totalorder %v816_v4, %v1926_v5 }
 0x153   : > { %1242 = vmatprep.subr.bf16.mxu0 %v1625_v35  ;;  %v1246_v59 = vpack.c.bf16 %v877_v56, %v876_v55  ;;  %v879_v61 = vsel %vm831_vm14, 1.0, %v863_v58  ;;  %vm849_vm2 = vcmp.eq.s32.totalorder %v817_v7, %v1926_v5  ;;  %vm832_vm3 = vcmp.lt.s32.totalorder %v816_v4, %v1926_v5 }
 0x154   : > { %v1249_v62 = vpack.c.bf16 %v879_v61, %v878_v60  ;;  %vm833_vm4 = vcmp.lt.s32.totalorder %v817_v7, %v1926_v5  ;;  %v864_v8 = vsel %vm848_vm1, 0.5, %v1624_v49  ;;  %v865_v9 = vsel %vm849_vm2, 0.5, %v1624_v49 }
 0x155   : > { %v880_v10 = vsel %vm832_vm3, 1.0, %v864_v8  ;;  %v881_v11 = vsel %vm833_vm4, 1.0, %v865_v9 }
 0x156   : > { %1244 = vmatpush3.bf16.msra.mxu0 %v1243_v51 }
 0x157   : > { %1245 = vmatprep.subr.bf16.mxu0 %v1625_v35 }
 0x15a   : > { %1247 = vmatpush3.bf16.msra.mxu0 %v1246_v59 }
 0x15b   : > { %1248 = vmatprep.subr.bf16.mxu0 %v1625_v35 }
 0x15e   : > { %1250 = vmatpush3.bf16.msra.mxu0 %v1249_v62 }
 0x15f   : > { %1251 = vmatprep.subr.bf16.mxu0 %v1625_v35 }
 0x220   : > { %v676_v14 = vpop.f32.mrb[0].mxu0 }
 0x221   : > { %v677_v15 = vadd.f32 %v676_v14, %v603_v12  ;;  %v678_v16 = vpop.f32.mrb[1].mxu0  ;;  %v818_v12 = vadd.s32 80, %v1928_v6  ;;  %v1252_v14 = vpack.c.bf16 %v881_v11, %v880_v10 }
 0x222   : > { %v679_v17 = vadd.f32 %v678_v16, %v607_v13  ;;  %v819_v13 = vadd.s32 88, %v1928_v6 }
 0x223   : > { %v683_v18 = vmul.f32 0.70710677, %v677_v15  ;;  %v681_v25 = vmul.f32 0.5, %v677_v15  ;;  %1253 = vmatpush3.bf16.msra.mxu0 %v1252_v14  ;;  %vm834_vm6 = vcmp.lt.s32.totalorder %v818_v12, %v1926_v5 }
 0x224   : > { %v684_v19 = vmul.f32 0.70710677, %v679_v17  ;;  %v682_v23 = vmul.f32 0.5, %v679_v17  ;;  %vm851_vm5 = vcmp.eq.s32.totalorder %v819_v13, %v1926_v5  ;;  %vm835_vm7 = vcmp.lt.s32.totalorder %v819_v13, %v1926_v5  ;;  %1254 = vmatprep.subr.bf16.mxu0 %v1625_v35 }
 0x225   : > { %1394 = verf.f32 %v683_v18  ;;  %v867_v16 = vsel %vm851_vm5, 0.5, %v1624_v49 }
 0x226   : > { %1396 = verf.f32 %v684_v19  ;;  %v883_v18 = vsel %vm835_vm7, 1.0, %v867_v16  ;;  %v820_v19 = vadd.s32 96, %v1928_v6 }
 0x228   : > { %vm836_vm8 = vcmp.lt.s32.totalorder %v820_v19, %v1926_v5  ;;  %vm852_vm10 = vcmp.eq.s32.totalorder %v820_v19, %v1926_v5 }
 0x22f   : > { %v1395_v20 = vpop.eup %1394 }
 0x230   : > { %v1397_v21 = vpop.eup %1396  ;;  %v687_v22 = vadd.f32 1.0, %v1395_v20  ;;  %v821_v20 = vadd.s32 104, %v1928_v6 }
 0x231   : > { %v688_v24 = vadd.f32 1.0, %v1397_v21 }
 0x232   : > { %v689_v27 = vmul.f32 %v687_v22, %v681_v25  ;;  %v822_v22 = vadd.s32 112, %v1928_v6  ;;  %vm837_vm9 = vcmp.lt.s32.totalorder %v821_v20, %v1926_v5  ;;  %vm853_vm11 = vcmp.eq.s32.totalorder %v821_v20, %v1926_v5 }
 0x233   : > { %v690_v26 = vmul.f32 %v688_v24, %v682_v23  ;;  %v823_v23 = vadd.s32 120, %v1928_v6  ;;  %v868_v24 = vsel %vm852_vm10, 0.5, %v1624_v49  ;;  %v869_v25 = vsel %vm853_vm11, 0.5, %v1624_v49 }
 0x234   : > { %vm838_vm13 = vcmp.lt.s32.totalorder %v822_v22, %v1926_v5  ;;  %v884_v6 = vsel %vm836_vm8, 1.0, %v868_v24  ;;  %vm854_vm0 = vcmp.eq.s32.totalorder %v822_v22, %v1926_v5 }
 0x235   : > { %788 = vmatprep.mubr.f32.mxu1 %v690_v26  ;;  %vm839_vm14 = vcmp.lt.s32.totalorder %v823_v23, %v1926_v5  ;;  %v885_v26 = vsel %vm837_vm9, 1.0, %v869_v25  ;;  %vm855_vm1 = vcmp.eq.s32.totalorder %v823_v23, %v1926_v5 }
 0x236   : > { %789 = vmatmul.mubr.f32.vlgmr.msra.gmra.mrb[0].mxu1 %v689_v27  ;;  %v1258_v27 = vpack.c.bf16 %v885_v26, %v884_v6 }
 0x309   : > { %v1120_v28 = vpop.f32.mrb[0].mxu1 }
 0x30a   : > { %v1121_v29 = vpop.f32.mrb[1].mxu1 }
 0x30b   : > { %v1122_v31 = vadd.f32 %v1121_v29, %v1120_v28  ;;  %v870_v28 = vsel %vm854_vm0, 0.5, %v1624_v49  ;;  %v871_v29 = vsel %vm855_vm1, 0.5, %v1624_v49 }
 0x30d   : > { %v791_v32 = vadd.f32 %v1122_v31, %v723_v30  ;;  %v886_v30 = vsel %vm838_vm13, 1.0, %v870_v28  ;;  %v887_v31 = vsel %vm839_vm14, 1.0, %v871_v29 }
 0x30f   : > { %v795_v33 = vsel %vm794_vm15, %v791_v32, -inf }
 0x310   : > { %796 = vmax.xlane.f32.xlu0 %v795_v33 }
 0x39d   : > { %v797_v63 = vpop.xlane.xlu0 %796 }
 0x39e   : > { %v798_v0 = vsub.f32 %v791_v32, %v797_v63  ;;  %v1261_v32 = vpack.c.bf16 %v887_v31, %v886_v30 }
 0x3a0   : > { %v799_v1 = vmul.f32 1.442695, %v798_v0 }
 0x3a2   : > { %1398 = vpow2.f32 %v799_v1 }
 0x3ac   : > { %v1399_v2 = vpop.eup %1398 }
 0x3ad   : > { %v801_v3 = vsel %vm794_vm15, %v1399_v2, 0.0  ;;  %vm850_vm15 = vcmp.eq.s32.totalorder %v818_v12, %v1926_v5 }
 0x3ae   : > { %802 = vadd.xlane.f32.xlu1 %v801_v3  ;;  %v866_v15 = vsel %vm850_vm15, 0.5, %v1624_v49 }
 0x3af   : > { %v882_v17 = vsel %vm834_vm6, 1.0, %v866_v15 }
 0x3b0   : > { %v1255_v21 = vpack.c.bf16 %v883_v18, %v882_v17 }
 0x3b2   : > { %1256 = vmatpush3.bf16.msra.mxu0 %v1255_v21 }
 0x3b3   : > { %1257 = vmatprep.subr.bf16.mxu0 %v1625_v35 }
 0x3b6   : > { %1259 = vmatpush3.bf16.msra.mxu0 %v1258_v27 }
 0x3b7   : > { %1260 = vmatprep.subr.bf16.mxu0 %v1625_v35 }
 0x3ba   : > { %1262 = vmatpush3.bf16.msra.mxu0 %v1261_v32 }
 0x43b   : > { %v803_v33 = vpop.xlane.xlu1 %802 }
 0x43c   : > { %1400 = vrcp.f32 %v803_v33 }
 0x446   : > { %v1401_v34 = vpop.eup %1400 }
 0x447   : > { %v805_v36 = vmul.f32 %v1401_v34, %v1399_v2 }
 0x449   : > { %v806_v37 = vmul.f32 9.999, %v805_v36 }
 0x44b   : > { %1173 = vmatmul.mubr.f32.vlgmr.msra.gmra.mrb[2].mxu0 %v806_v37 }
 0x51e   : > { %v954_v5 = vpop.f32.mrb[2].mxu0 }
 0x51f   : > { %v955_v38 = vadd.f32 0.001, %v954_v5  ;;  %v1174_v39 = vpop.f32.mrb[3].mxu0 }
 0x521   : > { %958 = vst [vmem:[%s1905_s17] sm:$0x1] %v955_v38 }
 0x522 PF: > { %s2154_s11 = sld [smem:[#allocation15_spill]]  ;;  %s1085_s15 = sshll.u32 %s1602_s25, 4 }
 0x523   : > { %s2155_s18 = sld [smem:[#allocation19_spill]]  ;;  %s972_s29 = sshll.u32 %s1905_s17, 4  ;;  %s973_s29 = int_to_ptr.vmem [resolvable:$true] %s972_s29 }
 0x524   : > { %s960_s6 = scalar_lea.sflag [#allocation5], %s284_s13  ;;  %s1488_s30 = scalar_lea.vmem %s973_s29, 16 }
 0x525   : > { %p1489_p6 = scmp.ne.s32.totalorder %s973_s29, %s1488_s30  ;;  %s1627_s14 = smov [#allocation9]  }
 0x526   : > { %s1492_s24 = sshll.u32 %s1627_s14, 4  ;;  %s1493_s24 = int_to_ptr.vmem [resolvable:$false] %s1492_s24 }
 0x527   : > { %s1494_s7 = scalar_lea.vmem %s1493_s24, 32  ;;  %p1495_p12 = scmp.lt.s32.totalorder %s973_s29, %s1493_s24 }
 0x528   : > { %p2157_p9 = scmp.ne.s32.totalorder %s2154_s11, 0  ;;  %p1496_p11 = scmp.lt.s32.totalorder %s1494_s7, %s1488_s30 }
 0x529   : > { %s2156_s1 = smov %s2155_s18  ;;  %s2051_s16 = scalar_lea.hbm %s2155_s18, %s1085_s15 }
 0x52a   : > { %p1490_p10 = pnand %p1489_p6, %p2157_p9  ;;  %p1497_p1 = por %p1496_p11, %p1495_p12 }
 0x52c   : > { %p1491_p5 = pneg %p1490_p10 }
 0x52e   : > { %p1498_p8 = pnand %p1497_p1, %p1491_p5 }
 0x530   : > { %1501 = shalt.err (!%p1498_p8)
}
 0x531   : > { %s1502_s25 = scalar_lea.hbm %s2051_s16, 16  ;;  %s1506_s10 = scalar_lea.hbm %s2156_s1, 32 }
 0x532   : > { %p1503_p4 = scmp.ne.s32.totalorder %s2051_s16, %s1502_s25  ;;  %p1507_p2 = scmp.lt.u32.totalorder %s2051_s16, %s2156_s1 }
 0x533   : > { %p1508_p0 = scmp.lt.u32.totalorder %s1506_s10, %s1502_s25  ;;  %p1510_p6 = scmp.lt.u32.totalorder %s1502_s25, %s2051_s16 }
 0x534   : > { %p1504_p3 = pnand %p1503_p4, %p2157_p9 }
 0x535   : > { %p1509_p7 = por %p1508_p0, %p1507_p2 }
 0x536   : > { %p1505_p13 = pneg %p1504_p3 }
 0x537   : > { %p1511_p10 = por %p1510_p6, %p1509_p7 }
 0x539   : > { %p1512_p5 = pnand %p1511_p10, %p1505_p13 }
 0x53b   : > { %1515 = shalt.err (!%p1512_p5)
}
 0x53c   : > { %1273 = dma.vmem_to_hbm [thread:$0]  (%p2157_p9), %s973_s29, 16, %s2051_s16, %s960_s6  }
 0x53d PF: > { %s2158_s9 = sld [smem:[#allocation14_spill]]  ;;  %s2159_s5 = sld [smem:[#allocation13_spill]] }
 0x53e   : > { %s2160_s18 = sld [smem:[#allocation16_spill]] }
 0x543   : > { %p1295_p12 = scmp.ge.s32.totalorder %s2158_s9, 2  ;;  %s984_s30 = sand.u32 1, %s2159_s5  }
 0x544   : > { %p2161_p11 = scmp.ne.s32.totalorder %s2160_s18, 0  ;;  %s985_s14 = scalar_lea.sflag [#allocation5], %s984_s30 }
 0x546   : > { %p1287_p1 = pnand %p1295_p12, %p2161_p11 }
 0x548   : > { %1569 = dma.done.wait (!%p1287_p1), %s985_s14, 16  }
 0x549   : > { %1571 = vsyncadd (!%p1287_p1), %s985_s14, 4294967280  ;;  %s22_s28 = sadd.s32 1, %s2158_s9   ;;  %s2162_s11 = smov %s1856_s21 }
 0x54a   : > { %p19_p8 = scmp.ge.s32.totalorder %s22_s28, 6   ;;  %s2163_s18 = smov %s1578_s19 }
 0x54b   : > { %s2164_s19 = smov %s1582_s20  ;;  %s2165_s20 = smov %s1851_s3 }
 0x54c   : > { %s2166_s21 = smov %s1590_s22  ;;  %s2167_s22 = smov %s1594_s23 }
 0x54d   : > { %s2168_s23 = smov %s2162_s11  ;;  %s2169_s24 = smov %s1606_s26 }
 0x54e   : > { %s2170_s25 = smov %s1610_s27  ;;  %s2171_s26 = smov %s2174_s8 }
 0x54f   : > { %s2172_s27 = smov %s2178_s12  ;;  %21 = sbr.rel (!%p19_p8) target bundleno = 14 (0xe), region = 101 }
 0x556   :  { %989 = vsyncpa [#allocation4], 1 }
 0x557   :  { %991 = vsyncpa [#allocation4 + $0x1], 1 }
 0x558   :  { %992 = vsyncpa [#allocation7], 1 }
 0x559   :  { %993 = vsyncpa [#allocation5], 1 }
 0x55a   :  { %995 = vsyncpa [#allocation5 + $0x1], 1 }

</bundles_post_ra>
